<compile_context>
chip_gen: v7x
topology: tpu7x:2x2x1
jax: 0.10.0
libtpu: 0.0.40
codegen_flags: <defaults>
</compile_context>

<pallas_src>
import jax
import jax.numpy as jnp
from jax.experimental import pallas as pl
from jax.experimental.pallas import tpu as pltpu

_LANE = 128
_SUBLANE = 8


def _round_up(x, m):
    return ((x + m - 1) // m) * m


def head_kernel(x_ref, w1_ref, b1_ref, w2_ref, b2_ref, w3_ref, b3_ref, o_ref):
    x = x_ref[...]                                            # (block_m, in_pad)

    # l1 + ReLU (MXU, f32 accumulate)
    h = jnp.dot(x, w1_ref[...], preferred_element_type=jnp.float32) + b1_ref[...]
    h = jnp.maximum(h, 0.0)

    # dropout(p=0.1) -> identity (eval/inference semantics)
    # TODO(synk): training-mode stochastic dropout would use pltpu.prng_seed/prng_random_bits.

    # l2 + ReLU — cast LHS to weight dtype so bf16 weights use the bf16 MXU path.
    h = jnp.dot(h.astype(w2_ref.dtype), w2_ref[...],
                preferred_element_type=jnp.float32) + b2_ref[...]
    h = jnp.maximum(h, 0.0)

    # l3 + Sigmoid
    z = jnp.dot(h.astype(w3_ref.dtype), w3_ref[...],
                preferred_element_type=jnp.float32) + b3_ref[...]
    o_ref[...] = jax.nn.sigmoid(z).astype(o_ref.dtype)


def classification_head(x, params, *, block_m=128, weight_dtype=None,
                        out_dtype=jnp.float32):
    """x: (B, input_size). params: dict of w1,b1,w2,b2,w3,b3 ((in,out)-layout weights)."""
    B, in_sz = x.shape
    hid_sz = params["w2"].shape[1]
    out_sz = params["w3"].shape[1]

    # Lane-align feature dims and sublane-align / decouple block_m from B.
    in_p = _round_up(in_sz, _LANE)
    hid_p = _round_up(hid_sz, _LANE)
    out_p = _round_up(out_sz, _LANE)
    block_m = max(_SUBLANE, _round_up(block_m, _SUBLANE))
    grid_m = pl.cdiv(B, block_m)
    b_p = grid_m * block_m

    def pad2(a, r, c, dt=None):
        a = a if dt is None else a.astype(dt)
        return jnp.pad(a, ((0, r - a.shape[0]), (0, c - a.shape[1])))

    xp = pad2(x, b_p, in_p)
    w1 = pad2(params["w1"], in_p, in_p, weight_dtype)
    w2 = pad2(params["w2"], in_p, hid_p, weight_dtype)
    w3 = pad2(params["w3"], hid_p, out_p, weight_dtype)
    b1 = pad2(params["b1"], 1, in_p)     # biases stay f32 (tiny, precision-cheap)
    b2 = pad2(params["b2"], 1, hid_p)
    b3 = pad2(params["b3"], 1, out_p)

    def resident(r, c):
        # Constant index_map -> block never changes across the grid; single-buffer it.
        return pl.BlockSpec((r, c), lambda i: (0, 0), pipeline_mode=pl.Buffered(1))

    # VMEM budget: double-buffered x/out tiles + single-buffered resident weights/biases
    # + live f32 intermediates; 2x headroom, capped at 64 MiB (v7x physical VMEM).
    xb = jnp.dtype(xp.dtype).itemsize
    wb = jnp.dtype(w1.dtype).itemsize
    est = (2 * block_m * in_p * xb
           + 2 * block_m * out_p * jnp.dtype(out_dtype).itemsize
           + (in_p * in_p + in_p * hid_p + hid_p * out_p) * wb
           + (in_p + hid_p + out_p) * 4
           + block_m * (in_p + hid_p) * 4)
    vmem_limit = int(min(max(2 * est, 16 << 20), 64 << 20))

    out_padded = pl.pallas_call(
        head_kernel,
        out_shape=jax.ShapeDtypeStruct((b_p, out_p), out_dtype),
        grid_spec=pltpu.PrefetchScalarGridSpec(
            num_scalar_prefetch=0,
            grid=(grid_m,),
            in_specs=[
                pl.BlockSpec((block_m, in_p), lambda i: (i, 0)),  # x tile (double-buffered)
                resident(in_p, in_p),   # w1
                resident(1, in_p),      # b1
                resident(in_p, hid_p),  # w2
                resident(1, hid_p),     # b2
                resident(hid_p, out_p), # w3
                resident(1, out_p),     # b3
            ],
            out_specs=pl.BlockSpec((block_m, out_p), lambda i: (i, 0)),
        ),
        compiler_params=pltpu.CompilerParams(
            dimension_semantics=("parallel",),
            vmem_limit_bytes=vmem_limit,
        ),
    )(xp, w1, b1, w2, b2, w3, b3)

    # Strip batch / lane padding (padded rows & sigmoid(0)=0.5 columns are discarded).
    return out_padded[:B, :out_sz]


def init_params(key, input_size, hidden_size, output_size):
    ks = jax.random.split(key, 6)

    def lin(kw, kb, fan_in, fan_out):
        bound = 1.0 / (fan_in ** 0.5)
        w = jax.random.uniform(kw, (fan_in, fan_out), jnp.float32, -bound, bound)
        b = jax.random.uniform(kb, (1, fan_out), jnp.float32, -bound, bound)
        return w, b

    w1, b1 = lin(ks[0], ks[1], input_size, input_size)
    w2, b2 = lin(ks[2], ks[3], input_size, hidden_size)
    w3, b3 = lin(ks[4], ks[5], hidden_size, output_size)
    return dict(w1=w1, b1=b1, w2=w2, b2=b2, w3=w3, b3=b3)


def reference(x, p):
    h = jnp.maximum(x @ p["w1"] + p["b1"], 0.0)
    h = jnp.maximum(h @ p["w2"] + p["b2"], 0.0)
    return jax.nn.sigmoid(h @ p["w3"] + p["b3"])


if __name__ == "__main__":
    key = jax.random.PRNGKey(0)
    k_x, k_p = jax.random.split(key)

    batch, input_size, hidden_size, output_size = 16, 32, 32, 16
    x = jax.random.normal(k_x, (batch, input_size), jnp.float32)
    params = init_params(k_p, input_size, hidden_size, output_size)

    # f32 weights: exact-path check against the reference forward.
    out = jax.block_until_ready(classification_head(x, params))
    ref = reference(x, params)
    assert out.shape == (batch, output_size)
    assert jnp.allclose(out, ref, atol=1e-5, rtol=1e-5)

    # bf16 weight streaming (fast path on v5e/v6e/v7x), f32 MXU accumulate.
    out_bf = jax.block_until_ready(
        classification_head(x, params, weight_dtype=jnp.bfloat16))
    p_bf = {k: (v.astype(jnp.bfloat16).astype(jnp.float32) if k.startswith("w") else v)
            for k, v in params.items()}
    assert jnp.allclose(out_bf, reference(x, p_bf), atol=5e-2)

    print("KERNEL_OK")
</pallas_src>

<mosaic_0001>
module attributes {stable_mosaic.version = 11 : i64} {
  func.func @head_kernel(%arg0: i32, %arg1: memref<128x128xf32, #tpu.memory_space<vmem>>, %arg2: memref<128x128xf32, #tpu.memory_space<vmem>>, %arg3: memref<1x128xf32, #tpu.memory_space<vmem>>, %arg4: memref<128x128xf32, #tpu.memory_space<vmem>>, %arg5: memref<1x128xf32, #tpu.memory_space<vmem>>, %arg6: memref<128x128xf32, #tpu.memory_space<vmem>>, %arg7: memref<1x128xf32, #tpu.memory_space<vmem>>, %arg8: memref<128x128xf32, #tpu.memory_space<vmem>>) attributes {dimension_semantics = [#tpu.dimension_semantics<parallel>], iteration_bounds = array<i64: 1>, scalar_prefetch = 0 : i64, scratch_operands = 0 : i64, tpu.core_type = #tpu.core_type<tc>, window_params = [{transform_indices = @transform_0, window_bounds = array<i64: 128, 128>}, {pipeline_mode = #tpu.pipeline_mode<synchronous>, transform_indices = @transform_1, window_bounds = array<i64: 128, 128>}, {pipeline_mode = #tpu.pipeline_mode<synchronous>, transform_indices = @transform_2, window_bounds = array<i64: 1, 128>}, {pipeline_mode = #tpu.pipeline_mode<synchronous>, transform_indices = @transform_3, window_bounds = array<i64: 128, 128>}, {pipeline_mode = #tpu.pipeline_mode<synchronous>, transform_indices = @transform_4, window_bounds = array<i64: 1, 128>}, {pipeline_mode = #tpu.pipeline_mode<synchronous>, transform_indices = @transform_5, window_bounds = array<i64: 128, 128>}, {pipeline_mode = #tpu.pipeline_mode<synchronous>, transform_indices = @transform_6, window_bounds = array<i64: 1, 128>}, {transform_indices = @transform_7, window_bounds = array<i64: 128, 128>}]} {
    %c0 = arith.constant 0 : index
    %c0_0 = arith.constant 0 : index
    %0 = vector.load %arg1[%c0, %c0_0] : memref<128x128xf32, #tpu.memory_space<vmem>>, vector<128x128xf32>
    %c0_1 = arith.constant 0 : index
    %c0_2 = arith.constant 0 : index
    %1 = vector.load %arg2[%c0_1, %c0_2] : memref<128x128xf32, #tpu.memory_space<vmem>>, vector<128x128xf32>
    %cst = arith.constant dense<0.000000e+00> : vector<128x128xf32>
    %2 = tpu.matmul %0, %1, %cst {dimension_numbers = #tpu.dot_dimension_numbers<[1], [0], [0], [1], [0, 0, 1, 1], [], []>} : vector<128x128xf32>, vector<128x128xf32>, vector<128x128xf32> -> vector<128x128xf32>
    %c0_3 = arith.constant 0 : index
    %c0_4 = arith.constant 0 : index
    %3 = vector.load %arg3[%c0_3, %c0_4] : memref<1x128xf32, #tpu.memory_space<vmem>>, vector<1x128xf32>
    %4 = vector.broadcast %3 : vector<1x128xf32> to vector<128x128xf32>
    %5 = arith.addf %2, %4 : vector<128x128xf32>
    %cst_5 = arith.constant 0.000000e+00 : f32
    %6 = vector.broadcast %cst_5 : f32 to vector<128x128xf32>
    %7 = arith.maximumf %5, %6 : vector<128x128xf32>
    %c0_6 = arith.constant 0 : index
    %c0_7 = arith.constant 0 : index
    %8 = vector.load %arg4[%c0_6, %c0_7] : memref<128x128xf32, #tpu.memory_space<vmem>>, vector<128x128xf32>
    %cst_8 = arith.constant dense<0.000000e+00> : vector<128x128xf32>
    %9 = tpu.matmul %7, %8, %cst_8 {dimension_numbers = #tpu.dot_dimension_numbers<[1], [0], [0], [1], [0, 0, 1, 1], [], []>} : vector<128x128xf32>, vector<128x128xf32>, vector<128x128xf32> -> vector<128x128xf32>
    %c0_9 = arith.constant 0 : index
    %c0_10 = arith.constant 0 : index
    %10 = vector.load %arg5[%c0_9, %c0_10] : memref<1x128xf32, #tpu.memory_space<vmem>>, vector<1x128xf32>
    %11 = vector.broadcast %10 : vector<1x128xf32> to vector<128x128xf32>
    %12 = arith.addf %9, %11 : vector<128x128xf32>
    %cst_11 = arith.constant 0.000000e+00 : f32
    %13 = vector.broadcast %cst_11 : f32 to vector<128x128xf32>
    %14 = arith.maximumf %12, %13 : vector<128x128xf32>
    %c0_12 = arith.constant 0 : index
    %c0_13 = arith.constant 0 : index
    %15 = vector.load %arg6[%c0_12, %c0_13] : memref<128x128xf32, #tpu.memory_space<vmem>>, vector<128x128xf32>
    %cst_14 = arith.constant dense<0.000000e+00> : vector<128x128xf32>
    %16 = tpu.matmul %14, %15, %cst_14 {dimension_numbers = #tpu.dot_dimension_numbers<[1], [0], [0], [1], [0, 0, 1, 1], [], []>} : vector<128x128xf32>, vector<128x128xf32>, vector<128x128xf32> -> vector<128x128xf32>
    %c0_15 = arith.constant 0 : index
    %c0_16 = arith.constant 0 : index
    %17 = vector.load %arg7[%c0_15, %c0_16] : memref<1x128xf32, #tpu.memory_space<vmem>>, vector<1x128xf32>
    %18 = vector.broadcast %17 : vector<1x128xf32> to vector<128x128xf32>
    %19 = arith.addf %16, %18 : vector<128x128xf32>
    %20 = arith.negf %19 : vector<128x128xf32>
    %21 = math.exp %20 : vector<128x128xf32>
    %cst_17 = arith.constant 1.000000e+00 : f32
    %22 = vector.broadcast %cst_17 : f32 to vector<128x128xf32>
    %23 = arith.addf %22, %21 : vector<128x128xf32>
    %24 = arith.divf %22, %23 : vector<128x128xf32>
    %c0_18 = arith.constant 0 : index
    %c0_19 = arith.constant 0 : index
    %25 = vector.load %arg8[%c0_18, %c0_19] : memref<128x128xf32, #tpu.memory_space<vmem>>, vector<128x128xf32>
    tpu.vector_store %arg8[%c0_18, %c0_19], %24 {strides = array<i32>} : memref<128x128xf32, #tpu.memory_space<vmem>>, vector<128x128xf32>,
    return
  }
  func.func @transform_0(%arg0: i32) -> (i32, i32) {
    %c0_i32 = arith.constant 0 : i32
    %c0_i32_0 = arith.constant 0 : i32
    return %arg0, %c0_i32 : i32, i32
  }
  func.func @transform_1(%arg0: i32) -> (i32, i32) {
    %c0_i32 = arith.constant 0 : i32
    %c0_i32_0 = arith.constant 0 : i32
    %c0_i32_1 = arith.constant 0 : i32
    return %c0_i32, %c0_i32_0 : i32, i32
  }
  func.func @transform_2(%arg0: i32) -> (i32, i32) {
    %c0_i32 = arith.constant 0 : i32
    %c0_i32_0 = arith.constant 0 : i32
    %c0_i32_1 = arith.constant 0 : i32
    return %c0_i32, %c0_i32_0 : i32, i32
  }
  func.func @transform_3(%arg0: i32) -> (i32, i32) {
    %c0_i32 = arith.constant 0 : i32
    %c0_i32_0 = arith.constant 0 : i32
    %c0_i32_1 = arith.constant 0 : i32
    return %c0_i32, %c0_i32_0 : i32, i32
  }
  func.func @transform_4(%arg0: i32) -> (i32, i32) {
    %c0_i32 = arith.constant 0 : i32
    %c0_i32_0 = arith.constant 0 : i32
    %c0_i32_1 = arith.constant 0 : i32
    return %c0_i32, %c0_i32_0 : i32, i32
  }
  func.func @transform_5(%arg0: i32) -> (i32, i32) {
    %c0_i32 = arith.constant 0 : i32
    %c0_i32_0 = arith.constant 0 : i32
    %c0_i32_1 = arith.constant 0 : i32
    return %c0_i32, %c0_i32_0 : i32, i32
  }
  func.func @transform_6(%arg0: i32) -> (i32, i32) {
    %c0_i32 = arith.constant 0 : i32
    %c0_i32_0 = arith.constant 0 : i32
    %c0_i32_1 = arith.constant 0 : i32
    return %c0_i32, %c0_i32_0 : i32, i32
  }
  func.func @transform_7(%arg0: i32) -> (i32, i32) {
    %c0_i32 = arith.constant 0 : i32
    %c0_i32_0 = arith.constant 0 : i32
    return %arg0, %c0_i32 : i32, i32
  }
}

</mosaic_0001>

<bundles_post_ra>
// kernel: tpu_custom_call.1
= control target key start
LH: loop header
LB: loop body
LE: loop exit
PB: predicated region body
PF: predicated region fallthrough
CT: control target
= control target key end

     0   :  { %12 = vsyncpa [#allocation3], 0  ;;  %s1554_s0 = inlined_call_operand.hbm [shape: f32[128,128], index: 0, kind: input, shape index: {}]   ;;  %s1555_s1 = inlined_call_operand.hbm [shape: f32[128,128], index: 1, kind: input, shape index: {}]   ;;  %s1556_s2 = inlined_call_operand.vmem [shape: f32[1,128], index: 2, kind: input, shape index: {}]   ;;  %s1557_s3 = inlined_call_operand.hbm [shape: f32[128,128], index: 3, kind: input, shape index: {}]   ;;  %s1558_s4 = inlined_call_operand.vmem [shape: f32[1,128], index: 4, kind: input, shape index: {}]   ;;  %s1559_s5 = inlined_call_operand.hbm [shape: f32[128,128], index: 5, kind: input, shape index: {}]   ;;  %s1560_s6 = inlined_call_operand.vmem [shape: f32[1,128], index: 6, kind: input, shape index: {}]   ;;  %s1561_s7 = inlined_call_operand.hbm [shape: f32[128,128], index: 7, kind: output, shape index: {}]  }
   0x1   :  { %13 = vsyncpa [#allocation6], 0 }
   0x2   :  { %14 = vsyncpa [#allocation9], 0 }
   0x3   :  { %15 = vsyncpa [#allocation4], 0  ;;  %s1349_s24 = smov [#allocation5]   ;;  %s1350_s26 = smov [#allocation2]  }
   0x4   :  { %s33_s25 = sshll.u32 %s1349_s24, 4  ;;  %s21_s27 = sshll.u32 %s1350_s26, 4  ;;  %s34_s25 = int_to_ptr.vmem [resolvable:$true] %s33_s25  ;;  %s1396_s27 = int_to_ptr.vmem [resolvable:$true] %s21_s27 }
   0x5   :  { %s1231_s30 = scalar_lea.hbm %s1555_s1, 2048 }
   0x6   :  { %p1232_p0 = scmp.ne.s32.totalorder %s1555_s1, %s1231_s30  ;;  %p1235_p1 = scmp.lt.u32.totalorder %s1231_s30, %s1555_s1 }
   0x8   :  { %p1237_p2 = pnand %p1235_p1, %p1232_p0 }
   0xa   :  { %1240 = shalt.err (!%p1237_p2)
}
   0xb   :  { %s1241_s12 = scalar_lea.vmem %s34_s25, 2048  ;;  %p1246_p4 = scmp.lt.s32.totalorder %s34_s25, %s34_s25 }
   0xc   :  { %p1242_p3 = scmp.ne.s32.totalorder %s34_s25, %s1241_s12  ;;  %p1247_p5 = scmp.lt.s32.totalorder %s1241_s12, %s1241_s12 }
   0xe   :  { %p1248_p6 = por %p1247_p5, %p1246_p4 }
  0x10   :  { %p1249_p7 = pnand %p1248_p6, %p1242_p3 }
  0x12   :  { %1252 = shalt.err (!%p1249_p7)
}
  0x13   :  { %s1351_s13 = smov 128   ;;  %s1352_s14 = smov 8  }
  0x14   :  { %39 = dma.hbm_to_vmem [thread:$0]  %s1555_s1, 2048, %s34_s25, [#allocation6], %s1351_s13, %s1351_s13, %s1352_s14  }
  0x15   :  { %s1253_s19 = scalar_lea.hbm %s1554_s0, 2048 }
  0x16   :  { %p1254_p8 = scmp.ne.s32.totalorder %s1554_s0, %s1253_s19  ;;  %p1257_p9 = scmp.lt.u32.totalorder %s1253_s19, %s1554_s0 }
  0x18   :  { %p1259_p10 = pnand %p1257_p9, %p1254_p8 }
  0x1a   :  { %1262 = shalt.err (!%p1259_p10)
}
  0x1b   :  { %s1263_s24 = scalar_lea.vmem %s1396_s27, 2048  ;;  %p1268_p12 = scmp.lt.s32.totalorder %s1396_s27, %s1396_s27 }
  0x1c   :  { %p1264_p11 = scmp.ne.s32.totalorder %s1396_s27, %s1263_s24  ;;  %p1269_p13 = scmp.lt.s32.totalorder %s1263_s24, %s1263_s24 }
  0x1e   :  { %p1270_p0 = por %p1269_p13, %p1268_p12 }
  0x20   :  { %p1271_p1 = pnand %p1270_p0, %p1264_p11 }
  0x22   :  { %1274 = shalt.err (!%p1271_p1)
}
  0x23   :  { %27 = dma.hbm_to_vmem [thread:$0]  %s1554_s0, 2048, %s1396_s27, [#allocation3], %s1351_s13, %s1351_s13, %s1352_s14  }
  0x24   :  { %s1353_s26 = smov [#allocation7]   ;;  %s1354_s29 = smov [#allocation8]  }
  0x25   :  { %s47_s28 = sshll.u32 %s1353_s26, 4  ;;  %s61_s30 = sshll.u32 %s1354_s29, 4  ;;  %s48_s28 = int_to_ptr.vmem [resolvable:$true] %s47_s28  ;;  %s1433_s30 = int_to_ptr.vmem [resolvable:$true] %s61_s30 }
  0x26   :  { %s1275_s10 = scalar_lea.hbm %s1557_s3, 2048 }
  0x27   :  { %p1276_p2 = scmp.ne.s32.totalorder %s1557_s3, %s1275_s10  ;;  %p1279_p3 = scmp.lt.u32.totalorder %s1275_s10, %s1557_s3 }
  0x29   :  { %p1281_p4 = pnand %p1279_p3, %p1276_p2 }
  0x2b   :  { %1284 = shalt.err (!%p1281_p4)
}
  0x2c   :  { %s1285_s0 = scalar_lea.vmem %s48_s28, 2048  ;;  %p1290_p6 = scmp.lt.s32.totalorder %s48_s28, %s48_s28 }
  0x2d   :  { %p1286_p5 = scmp.ne.s32.totalorder %s48_s28, %s1285_s0  ;;  %p1291_p7 = scmp.lt.s32.totalorder %s1285_s0, %s1285_s0 }
  0x2f   :  { %p1292_p8 = por %p1291_p7, %p1290_p6 }
  0x31   :  { %p1293_p9 = pnand %p1292_p8, %p1286_p5 }
  0x33   :  { %1296 = shalt.err (!%p1293_p9)
}
  0x34   :  { %53 = dma.hbm_to_vmem [thread:$0]  %s1557_s3, 2048, %s48_s28, [#allocation6], %s1351_s13, %s1351_s13, %s1352_s14  }
  0x35   :  { %s1297_s20 = scalar_lea.hbm %s1559_s5, 2048 }
  0x36   :  { %p1298_p10 = scmp.ne.s32.totalorder %s1559_s5, %s1297_s20  ;;  %p1301_p11 = scmp.lt.u32.totalorder %s1297_s20, %s1559_s5 }
  0x38   :  { %p1303_p12 = pnand %p1301_p11, %p1298_p10 }
  0x3a   :  { %1306 = shalt.err (!%p1303_p12)
}
  0x3b   :  { %s1307_s1 = scalar_lea.vmem %s1433_s30, 2048  ;;  %p1312_p0 = scmp.lt.s32.totalorder %s1433_s30, %s1433_s30 }
  0x3c   :  { %p1308_p13 = scmp.ne.s32.totalorder %s1433_s30, %s1307_s1  ;;  %p1313_p1 = scmp.lt.s32.totalorder %s1307_s1, %s1307_s1 }
  0x3e   :  { %p1314_p2 = por %p1313_p1, %p1312_p0 }
  0x40   :  { %p1315_p3 = pnand %p1314_p2, %p1308_p13 }
  0x42   :  { %1318 = shalt.err (!%p1315_p3)
}
  0x43   :  { %67 = dma.hbm_to_vmem [thread:$0]  %s1559_s5, 2048, %s1433_s30, [#allocation9], %s1351_s13, %s1351_s13, %s1352_s14  }
  0x44   :  { %1341 = dma.done.wait [#allocation3], 2048  }
  0x45   :  { %1342 = vsyncadd [#allocation3], 4294965248 }
  0x46   :  { %1343 = dma.done.wait [#allocation6], 4096  }
  0x47   :  { %1344 = vsyncadd [#allocation6], 4294963200 }
  0x48   :  { %1345 = dma.done.wait [#allocation9], 2048  }
  0x49   :  { %1346 = vsyncadd [#allocation9], 4294965248  ;;  %v98_v0 = vld [vmem:[#allocation5] sm:$0xff]  ;;  %v99_v1 = vld [vmem:[#allocation5 + $0x8] sm:$0xff] }
  0x4a   :  { %v100_v2 = vld [vmem:[#allocation5 + $0x10] sm:$0xff]  ;;  %v1048_v3 = vpack.c.bf16 %v99_v1, %v98_v0  ;;  %v101_v4 = vld [vmem:[#allocation5 + $0x18] sm:$0xff]  ;;  %v102_v6 = vld [vmem:[#allocation5 + $0x20] sm:$0xff] }
  0x4b   :  { %v1052_v5 = vpack.c.bf16 %v101_v4, %v100_v2  ;;  %v103_v7 = vld [vmem:[#allocation5 + $0x28] sm:$0xff]  ;;  %v82_v9 = vld [vmem:[#allocation2] sm:$0xff]  ;;  %v104_v10 = vld [vmem:[#allocation5 + $0x30] sm:$0xff] }
  0x4c   :  { %1049 = vmatprep.subr.bf16.mxu0 %v1048_v3  ;;  %v1056_v8 = vpack.c.bf16 %v103_v7, %v102_v6  ;;  %v105_v11 = vld [vmem:[#allocation5 + $0x38] sm:$0xff]  ;;  %912 = vmatprep.mubr.f32.mxu0 %v82_v9  ;;  %v106_v13 = vld [vmem:[#allocation5 + $0x40] sm:$0xff]  ;;  %v107_v14 = vld [vmem:[#allocation5 + $0x48] sm:$0xff] }
  0x4d   :  { %1051 = vmatpush3.bf16.msra.mxu0 %v1048_v3  ;;  %v1060_v12 = vpack.c.bf16 %v105_v11, %v104_v10  ;;  %v282_v15 = vld [vmem:[#allocation7] sm:$0xff]  ;;  %v283_v16 = vld [vmem:[#allocation7 + $0x8] sm:$0xff]  ;;  %v284_v17 = vld [vmem:[#allocation7 + $0x10] sm:$0xff]  ;;  %v1064_v21 = vpack.c.bf16 %v107_v14, %v106_v13 }
  0x4e   :  { %1053 = vmatprep.subr.bf16.mxu0 %v1052_v5  ;;  %v285_v18 = vld [vmem:[#allocation7 + $0x18] sm:$0xff]  ;;  %v1080_v19 = vpack.c.bf16 %v283_v16, %v282_v15  ;;  %v286_v22 = vld [vmem:[#allocation7 + $0x20] sm:$0xff]  ;;  %v287_v23 = vld [vmem:[#allocation7 + $0x28] sm:$0xff] }
  0x4f   :  { %v1084_v20 = vpack.c.bf16 %v285_v18, %v284_v17  ;;  %v108_v24 = vld [vmem:[#allocation5 + $0x50] sm:$0xff]  ;;  %v109_v25 = vld [vmem:[#allocation5 + $0x58] sm:$0xff]  ;;  %v1088_v26 = vpack.c.bf16 %v287_v23, %v286_v22  ;;  %v110_v30 = vld [vmem:[#allocation5 + $0x60] sm:$0xff] }
  0x50   :  { %1081 = vmatprep.subr.bf16.mxu1 %v1080_v19  ;;  %v1068_v27 = vpack.c.bf16 %v109_v25, %v108_v24  ;;  %v288_v28 = vld [vmem:[#allocation7 + $0x30] sm:$0xff]  ;;  %v289_v29 = vld [vmem:[#allocation7 + $0x38] sm:$0xff]  ;;  %v111_v31 = vld [vmem:[#allocation5 + $0x68] sm:$0xff] }
  0x51   :  { %1055 = vmatpush3.bf16.msra.mxu0 %v1052_v5  ;;  %1083 = vmatpush3.bf16.msra.mxu1 %v1080_v19  ;;  %v1092_v32 = vpack.c.bf16 %v289_v29, %v288_v28  ;;  %v1072_v33 = vpack.c.bf16 %v111_v31, %v110_v30  ;;  %v290_v34 = vld [vmem:[#allocation7 + $0x40] sm:$0xff]  ;;  %v291_v35 = vld [vmem:[#allocation7 + $0x48] sm:$0xff]  ;;  %v112_v36 = vld [vmem:[#allocation5 + $0x70] sm:$0xff] }
  0x52   :  { %1057 = vmatprep.subr.bf16.mxu0 %v1056_v8  ;;  %1085 = vmatprep.subr.bf16.mxu1 %v1084_v20  ;;  %v113_v37 = vld [vmem:[#allocation5 + $0x78] sm:$0xff]  ;;  %v1096_v38 = vpack.c.bf16 %v291_v35, %v290_v34  ;;  %v292_v40 = vld [vmem:[#allocation7 + $0x50] sm:$0xff]  ;;  %v294_v43 = vld [vmem:[#allocation7 + $0x60] sm:$0xff] }
  0x53   :  { %v1076_v39 = vpack.c.bf16 %v113_v37, %v112_v36  ;;  %v293_v41 = vld [vmem:[#allocation7 + $0x58] sm:$0xff]  ;;  %v295_v44 = vld [vmem:[#allocation7 + $0x68] sm:$0xff]  ;;  %v84_v47 = vld [vmem:[#allocation2 + $0x10] sm:$0xff] }
  0x54   :  { %v1100_v42 = vpack.c.bf16 %v293_v41, %v292_v40  ;;  %v83_v45 = vld [vmem:[#allocation2 + $0x8] sm:$0xff]  ;;  %v1104_v46 = vpack.c.bf16 %v295_v44, %v294_v43  ;;  %v85_v48 = vld [vmem:[#allocation2 + $0x18] sm:$0xff]  ;;  %v86_v49 = vld [vmem:[#allocation2 + $0x20] sm:$0xff] }
  0x55   :  { %1059 = vmatpush3.bf16.msra.mxu0 %v1056_v8  ;;  %1087 = vmatpush3.bf16.msra.mxu1 %v1084_v20  ;;  %v87_v50 = vld [vmem:[#allocation2 + $0x28] sm:$0xff]  ;;  %v88_v51 = vld [vmem:[#allocation2 + $0x30] sm:$0xff]  ;;  %v89_v52 = vld [vmem:[#allocation2 + $0x38] sm:$0xff] }
  0x56   :  { %1061 = vmatprep.subr.bf16.mxu0 %v1060_v12  ;;  %1089 = vmatprep.subr.bf16.mxu1 %v1088_v26  ;;  %v90_v53 = vld [vmem:[#allocation2 + $0x40] sm:$0xff]  ;;  %v91_v54 = vld [vmem:[#allocation2 + $0x48] sm:$0xff]  ;;  %v92_v55 = vld [vmem:[#allocation2 + $0x50] sm:$0xff] }
  0x57   :  { %v93_v56 = vld [vmem:[#allocation2 + $0x58] sm:$0xff]  ;;  %v94_v57 = vld [vmem:[#allocation2 + $0x60] sm:$0xff]  ;;  %v95_v58 = vld [vmem:[#allocation2 + $0x68] sm:$0xff] }
  0x58   :  { %v96_v59 = vld [vmem:[#allocation2 + $0x70] sm:$0xff]  ;;  %v97_v60 = vld [vmem:[#allocation2 + $0x78] sm:$0xff]  ;;  %v466_v0 = vld [vmem:[#allocation8] sm:$0xff] }
  0x59   :  { %1063 = vmatpush3.bf16.msra.mxu0 %v1060_v12  ;;  %1091 = vmatpush3.bf16.msra.mxu1 %v1088_v26  ;;  %v296_v61 = vld [vmem:[#allocation7 + $0x70] sm:$0xff]  ;;  %v297_v62 = vld [vmem:[#allocation7 + $0x78] sm:$0xff]  ;;  %v467_v1 = vld [vmem:[#allocation8 + $0x8] sm:$0xff] }
  0x5a   :  { %1065 = vmatprep.subr.bf16.mxu0 %v1064_v21  ;;  %1093 = vmatprep.subr.bf16.mxu1 %v1092_v32  ;;  %v1108_v63 = vpack.c.bf16 %v297_v62, %v296_v61  ;;  %v468_v2 = vld [vmem:[#allocation8 + $0x10] sm:$0xff]  ;;  %v1112_v3 = vpack.c.bf16 %v467_v1, %v466_v0  ;;  %v469_v4 = vld [vmem:[#allocation8 + $0x18] sm:$0xff]  ;;  %v470_v6 = vld [vmem:[#allocation8 + $0x20] sm:$0xff] }
  0x5b   :  { %v1116_v5 = vpack.c.bf16 %v469_v4, %v468_v2  ;;  %v471_v7 = vld [vmem:[#allocation8 + $0x28] sm:$0xff]  ;;  %v472_v9 = vld [vmem:[#allocation8 + $0x30] sm:$0xff]  ;;  %v473_v10 = vld [vmem:[#allocation8 + $0x38] sm:$0xff] }
  0x5c   :  { %v1120_v8 = vpack.c.bf16 %v471_v7, %v470_v6  ;;  %v1470_v11 = vpack.c.bf16 %v473_v10, %v472_v9  ;;  %v474_v12 = vld [vmem:[#allocation8 + $0x40] sm:$0xff]  ;;  %v475_v13 = vld [vmem:[#allocation8 + $0x48] sm:$0xff]  ;;  %v476_v15 = vld [vmem:[#allocation8 + $0x50] sm:$0xff] }
  0x5d   :  { %1067 = vmatpush3.bf16.msra.mxu0 %v1064_v21  ;;  %1095 = vmatpush3.bf16.msra.mxu1 %v1092_v32  ;;  %v1473_v14 = vpack.c.bf16 %v475_v13, %v474_v12  ;;  %v477_v16 = vld [vmem:[#allocation8 + $0x58] sm:$0xff]  ;;  %v478_v18 = vld [vmem:[#allocation8 + $0x60] sm:$0xff]  ;;  %v479_v19 = vld [vmem:[#allocation8 + $0x68] sm:$0xff] }
  0x5e   :  { %1069 = vmatprep.subr.bf16.mxu0 %v1068_v27  ;;  %1097 = vmatprep.subr.bf16.mxu1 %v1096_v38  ;;  %v1477_v17 = vpack.c.bf16 %v477_v16, %v476_v15  ;;  %v1481_v20 = vpack.c.bf16 %v479_v19, %v478_v18  ;;  %v1489_v21 = vld [vmem:[%s1556_s2] ss:$0 sm:$0xff]  ;;  %v480_v6 = vld [vmem:[#allocation8 + $0x70] sm:$0xff]  ;;  %v481_v7 = vld [vmem:[#allocation8 + $0x78] sm:$0xff] }
  0x5f   :  { %v766_v9 = vld [vmem:[%s1558_s4] ss:$0 sm:$0xff] }
  0x61   :  { %1071 = vmatpush3.bf16.msra.mxu0 %v1068_v27  ;;  %1099 = vmatpush3.bf16.msra.mxu1 %v1096_v38 }
  0x62   :  { %1073 = vmatprep.subr.bf16.mxu0 %v1072_v33  ;;  %1101 = vmatprep.subr.bf16.mxu1 %v1100_v42 }
  0x65   :  { %1075 = vmatpush3.bf16.msra.mxu0 %v1072_v33  ;;  %1103 = vmatpush3.bf16.msra.mxu1 %v1100_v42 }
  0x66   :  { %1077 = vmatprep.subr.bf16.mxu0 %v1076_v39  ;;  %1105 = vmatprep.subr.bf16.mxu1 %v1104_v46 }
  0x69   :  { %1079 = vmatpush3.bf16.msra.mxu0 %v1076_v39  ;;  %1107 = vmatpush3.bf16.msra.mxu1 %v1104_v46 }
  0x6a   :  { %1109 = vmatprep.subr.bf16.mxu1 %v1108_v63  ;;  %1113 = vmatprep.subr.bf16.mxu0 %v1112_v3 }
  0x6c   :  { %913 = vmatmul.mubr.f32.vlgmr.msra.gmra.mrb[0].mxu0 %v83_v45 }
  0x6d   :  { %915 = vmatprep.mubr.f32.mxu0 %v84_v47  ;;  %1111 = vmatpush3.bf16.msra.mxu1 %v1108_v63 }
  0x6e   :  { %1144 = vmatprep.subr.bf16.mxu1 %v1112_v3  ;;  %1115 = vmatpush3.bf16.msra.mxu0 %v1112_v3 }
  0x6f   :  { %1117 = vmatprep.subr.bf16.mxu0 %v1116_v5 }
  0x70   :  { %916 = vmatmul.mubr.f32.gmra.mrb[2].mxu0 %v85_v48 }
  0x71   :  { %918 = vmatprep.mubr.f32.mxu0 %v86_v49 }
  0x72   :  { %1119 = vmatpush3.bf16.msra.mxu0 %v1116_v5 }
  0x73   :  { %1121 = vmatprep.subr.bf16.mxu0 %v1120_v8 }
  0x74   :  { %919 = vmatmul.mubr.f32.gmra.mrb[4].mxu0 %v87_v50 }
  0x75   :  { %921 = vmatprep.mubr.f32.mxu0 %v88_v51 }
  0x76   :  { %1123 = vmatpush3.bf16.msra.mxu0 %v1120_v8 }
  0x77   :  { %1125 = vmatprep.subr.bf16.mxu0 %v1470_v11 }
  0x78   :  { %922 = vmatmul.mubr.f32.gmra.mrb[6].mxu0 %v89_v52 }
  0x79   :  { %924 = vmatprep.mubr.f32.mxu0 %v90_v53 }
  0x7a   :  { %1127 = vmatpush3.bf16.msra.mxu0 %v1470_v11 }
  0x7b   :  { %1129 = vmatprep.subr.bf16.mxu0 %v1473_v14 }
  0x7c   :  { %925 = vmatmul.mubr.f32.gmra.mrb[8].mxu0 %v91_v54 }
  0x7d   :  { %927 = vmatprep.mubr.f32.mxu0 %v92_v55 }
  0x7e   :  { %1131 = vmatpush3.bf16.msra.mxu0 %v1473_v14 }
  0x7f   :  { %1133 = vmatprep.subr.bf16.mxu0 %v1477_v17 }
  0x80   :  { %928 = vmatmul.mubr.f32.gmra.mrb[10].mxu0 %v93_v56 }
  0x81   :  { %930 = vmatprep.mubr.f32.mxu0 %v94_v57 }
  0x82   :  { %1135 = vmatpush3.bf16.msra.mxu0 %v1477_v17 }
  0x83   :  { %1137 = vmatprep.subr.bf16.mxu0 %v1481_v20 }
  0x84   :  { %931 = vmatmul.mubr.f32.gmra.mrb[12].mxu0 %v95_v58 }
  0x85   :  { %933 = vmatprep.mubr.f32.mxu0 %v96_v59 }
  0x86   :  { %1139 = vmatpush3.bf16.msra.mxu0 %v1481_v20 }
  0x88   :  { %934 = vmatmul.mubr.f32.gmra.mrb[14].mxu0 %v97_v60 }
 0x13f   :  { %v914_v22 = vpop.f32.mrb[0].mxu0 }
 0x140   :  { %v193_v23 = vadd.f32 %v914_v22, %v1489_v21  ;;  %v187_v24 = vpop.f32.mrb[1].mxu0 }
 0x141   :  { %v188_v25 = vadd.f32 %v1489_v21, %v187_v24 }
 0x142   :  { %v267_v28 = vmax.f32 %v193_v23, 0.0 }
 0x143   :  { %v917_v26 = vpop.f32.mrb[2].mxu0  ;;  %v266_v27 = vmax.f32 %v188_v25, 0.0 }
 0x144   :  { %v203_v29 = vadd.f32 %v917_v26, %v1489_v21  ;;  %v197_v30 = vpop.f32.mrb[3].mxu0 }
 0x145   :  { %v198_v31 = vadd.f32 %v1489_v21, %v197_v30  ;;  %968 = vmatprep.mubr.f32.mxu1 %v266_v27 }
 0x146   :  { %969 = vmatmul.mubr.f32.vlgmr.msra.gmra.mrb[0].mxu1 %v267_v28  ;;  %v269_v34 = vmax.f32 %v203_v29, 0.0 }
 0x147   :  { %v268_v32 = vmax.f32 %v198_v31, 0.0  ;;  %v920_v33 = vpop.f32.mrb[4].mxu0  ;;  %1152 = vmatpush3.bf16.msra.mxu1 %v1112_v3 }
 0x148   :  { %v213_v35 = vadd.f32 %v920_v33, %v1489_v21  ;;  %v207_v36 = vpop.f32.mrb[5].mxu0  ;;  %1145 = vmatprep.subr.bf16.mxu1 %v1116_v5 }
 0x149   :  { %v208_v37 = vadd.f32 %v1489_v21, %v207_v36  ;;  %971 = vmatprep.mubr.f32.mxu1 %v268_v32 }
 0x14a   :  { %972 = vmatmul.mubr.f32.gmra.mrb[2].mxu1 %v269_v34  ;;  %v271_v40 = vmax.f32 %v213_v35, 0.0 }
 0x14b   :  { %v270_v38 = vmax.f32 %v208_v37, 0.0  ;;  %v923_v39 = vpop.f32.mrb[6].mxu0  ;;  %1153 = vmatpush3.bf16.msra.mxu1 %v1116_v5 }
 0x14c   :  { %v223_v41 = vadd.f32 %v923_v39, %v1489_v21  ;;  %v217_v42 = vpop.f32.mrb[7].mxu0  ;;  %1146 = vmatprep.subr.bf16.mxu1 %v1120_v8 }
 0x14d   :  { %v218_v43 = vadd.f32 %v1489_v21, %v217_v42  ;;  %974 = vmatprep.mubr.f32.mxu1 %v270_v38 }
 0x14e   :  { %975 = vmatmul.mubr.f32.gmra.mrb[4].mxu1 %v271_v40  ;;  %v273_v46 = vmax.f32 %v223_v41, 0.0 }
 0x14f   :  { %v272_v44 = vmax.f32 %v218_v43, 0.0  ;;  %v926_v45 = vpop.f32.mrb[8].mxu0  ;;  %1154 = vmatpush3.bf16.msra.mxu1 %v1120_v8  ;;  %v1140_v8 = vpack.c.bf16 %v481_v7, %v480_v6 }
 0x150   :  { %v233_v47 = vadd.f32 %v926_v45, %v1489_v21  ;;  %v227_v48 = vpop.f32.mrb[9].mxu0  ;;  %1147 = vmatprep.subr.bf16.mxu1 %v1470_v11 }
 0x151   :  { %v228_v49 = vadd.f32 %v1489_v21, %v227_v48  ;;  %977 = vmatprep.mubr.f32.mxu1 %v272_v44  ;;  %1141 = vmatprep.subr.bf16.mxu0 %v1140_v8 }
 0x152   :  { %978 = vmatmul.mubr.f32.gmra.mrb[6].mxu1 %v273_v46  ;;  %v275_v52 = vmax.f32 %v233_v47, 0.0  ;;  %1143 = vmatpush3.bf16.msra.mxu0 %v1140_v8 }
 0x153   :  { %v274_v50 = vmax.f32 %v228_v49, 0.0  ;;  %v929_v51 = vpop.f32.mrb[10].mxu0  ;;  %1155 = vmatpush3.bf16.msra.mxu1 %v1470_v11 }
 0x154   :  { %v243_v53 = vadd.f32 %v929_v51, %v1489_v21  ;;  %v237_v54 = vpop.f32.mrb[11].mxu0  ;;  %1148 = vmatprep.subr.bf16.mxu1 %v1473_v14 }
 0x155   :  { %v238_v55 = vadd.f32 %v1489_v21, %v237_v54  ;;  %980 = vmatprep.mubr.f32.mxu1 %v274_v50 }
 0x156   :  { %981 = vmatmul.mubr.f32.gmra.mrb[8].mxu1 %v275_v52  ;;  %v277_v58 = vmax.f32 %v243_v53, 0.0 }
 0x157   :  { %v276_v56 = vmax.f32 %v238_v55, 0.0  ;;  %v932_v57 = vpop.f32.mrb[12].mxu0  ;;  %1156 = vmatpush3.bf16.msra.mxu1 %v1473_v14 }
 0x158   :  { %v253_v59 = vadd.f32 %v932_v57, %v1489_v21  ;;  %v247_v60 = vpop.f32.mrb[13].mxu0  ;;  %1149 = vmatprep.subr.bf16.mxu1 %v1477_v17 }
 0x159   :  { %v248_v61 = vadd.f32 %v1489_v21, %v247_v60  ;;  %983 = vmatprep.mubr.f32.mxu1 %v276_v56 }
 0x15a   :  { %984 = vmatmul.mubr.f32.gmra.mrb[10].mxu1 %v277_v58  ;;  %v279_v0 = vmax.f32 %v253_v59, 0.0  ;;  %v1521_v58 = vld [vmem:[%s1560_s6] ss:$0 sm:$0xff]  ;;  %s1355_s6 = smov [#allocation10]  }
 0x15b   :  { %v278_v62 = vmax.f32 %v248_v61, 0.0  ;;  %v935_v63 = vpop.f32.mrb[14].mxu0  ;;  %1157 = vmatpush3.bf16.msra.mxu1 %v1477_v17  ;;  %s751_s30 = sshll.u32 %s1355_s6, 4  ;;  %s752_s30 = int_to_ptr.vmem [resolvable:$true] %s751_s30 }
 0x15c   :  { %v263_v1 = vadd.f32 %v935_v63, %v1489_v21  ;;  %v257_v2 = vpop.f32.mrb[15].mxu0  ;;  %1150 = vmatprep.subr.bf16.mxu1 %v1481_v20  ;;  %s1319_s8 = scalar_lea.vmem %s752_s30, 2048  ;;  %p1324_p5 = scmp.lt.s32.totalorder %s752_s30, %s752_s30 }
 0x15d   :  { %v258_v3 = vadd.f32 %v1489_v21, %v257_v2  ;;  %986 = vmatprep.mubr.f32.mxu1 %v278_v62  ;;  %p1320_p4 = scmp.ne.s32.totalorder %s752_s30, %s1319_s8  ;;  %p1325_p6 = scmp.lt.s32.totalorder %s1319_s8, %s1319_s8 }
 0x15e   :  { %987 = vmatmul.mubr.f32.gmra.mrb[12].mxu1 %v279_v0  ;;  %v281_v5 = vmax.f32 %v263_v1, 0.0 }
 0x15f   :  { %v280_v4 = vmax.f32 %v258_v3, 0.0  ;;  %1158 = vmatpush3.bf16.msra.mxu1 %v1481_v20  ;;  %p1326_p7 = por %p1325_p6, %p1324_p5 }
 0x160   :  { %1151 = vmatprep.subr.bf16.mxu1 %v1140_v8 }
 0x161   :  { %989 = vmatprep.mubr.f32.mxu1 %v280_v4  ;;  %p1327_p8 = pnand %p1326_p7, %p1320_p4 }
 0x162   :  { %990 = vmatmul.mubr.f32.gmra.mrb[14].mxu1 %v281_v5 }
 0x163   :  { %1159 = vmatpush3.bf16.msra.mxu1 %v1140_v8 }
 0x219   :  { %v970_v10 = vpop.f32.mrb[0].mxu1 }
 0x21a   :  { %v377_v11 = vadd.f32 %v970_v10, %v766_v9  ;;  %v371_v12 = vpop.f32.mrb[1].mxu1 }
 0x21b   :  { %v372_v13 = vadd.f32 %v766_v9, %v371_v12 }
 0x21c   :  { %v451_v16 = vmax.f32 %v377_v11, 0.0 }
 0x21d   :  { %v450_v14 = vmax.f32 %v372_v13, 0.0  ;;  %v973_v15 = vpop.f32.mrb[2].mxu1 }
 0x21e   :  { %v387_v17 = vadd.f32 %v973_v15, %v766_v9  ;;  %v381_v18 = vpop.f32.mrb[3].mxu1 }
 0x21f   :  { %v382_v19 = vadd.f32 %v766_v9, %v381_v18  ;;  %1024 = vmatprep.mubr.f32.mxu0 %v450_v14 }
 0x220   :  { %1025 = vmatmul.mubr.f32.vlgmr.msra.gmra.mrb[16].mxu0 %v451_v16  ;;  %v453_v22 = vmax.f32 %v387_v17, 0.0 }
 0x221   :  { %v452_v20 = vmax.f32 %v382_v19, 0.0  ;;  %v976_v21 = vpop.f32.mrb[4].mxu1 }
 0x222   :  { %v397_v23 = vadd.f32 %v976_v21, %v766_v9  ;;  %v391_v24 = vpop.f32.mrb[5].mxu1 }
 0x223   :  { %v392_v25 = vadd.f32 %v766_v9, %v391_v24  ;;  %1027 = vmatprep.mubr.f32.mxu0 %v452_v20 }
 0x224   :  { %1028 = vmatmul.mubr.f32.gmra.mrb[18].mxu0 %v453_v22  ;;  %v455_v28 = vmax.f32 %v397_v23, 0.0 }
 0x225   :  { %v454_v26 = vmax.f32 %v392_v25, 0.0  ;;  %v979_v27 = vpop.f32.mrb[6].mxu1 }
 0x226   :  { %v407_v29 = vadd.f32 %v979_v27, %v766_v9  ;;  %v401_v30 = vpop.f32.mrb[7].mxu1 }
 0x227   :  { %v402_v31 = vadd.f32 %v766_v9, %v401_v30  ;;  %1030 = vmatprep.mubr.f32.mxu0 %v454_v26 }
 0x228   :  { %1031 = vmatmul.mubr.f32.gmra.mrb[20].mxu0 %v455_v28  ;;  %v457_v34 = vmax.f32 %v407_v29, 0.0 }
 0x229   :  { %v456_v32 = vmax.f32 %v402_v31, 0.0  ;;  %v982_v33 = vpop.f32.mrb[8].mxu1 }
 0x22a   :  { %v417_v35 = vadd.f32 %v982_v33, %v766_v9  ;;  %v411_v36 = vpop.f32.mrb[9].mxu1 }
 0x22b   :  { %v412_v37 = vadd.f32 %v766_v9, %v411_v36  ;;  %1033 = vmatprep.mubr.f32.mxu0 %v456_v32 }
 0x22c   :  { %1034 = vmatmul.mubr.f32.gmra.mrb[22].mxu0 %v457_v34  ;;  %v459_v40 = vmax.f32 %v417_v35, 0.0 }
 0x22d   :  { %v458_v38 = vmax.f32 %v412_v37, 0.0  ;;  %v985_v39 = vpop.f32.mrb[10].mxu1 }
 0x22e   :  { %v427_v41 = vadd.f32 %v985_v39, %v766_v9  ;;  %v421_v42 = vpop.f32.mrb[11].mxu1 }
 0x22f   :  { %v422_v43 = vadd.f32 %v766_v9, %v421_v42  ;;  %1036 = vmatprep.mubr.f32.mxu1 %v458_v38 }
 0x230   :  { %1037 = vmatmul.mubr.f32.vlgmr.msra.gmra.mrb[16].mxu1 %v459_v40  ;;  %v461_v46 = vmax.f32 %v427_v41, 0.0 }
 0x231   :  { %v460_v44 = vmax.f32 %v422_v43, 0.0  ;;  %v988_v45 = vpop.f32.mrb[12].mxu1 }
 0x232   :  { %v437_v47 = vadd.f32 %v988_v45, %v766_v9  ;;  %v431_v48 = vpop.f32.mrb[13].mxu1 }
 0x233   :  { %v432_v49 = vadd.f32 %v766_v9, %v431_v48  ;;  %1039 = vmatprep.mubr.f32.mxu1 %v460_v44 }
 0x234   :  { %1040 = vmatmul.mubr.f32.gmra.mrb[18].mxu1 %v461_v46  ;;  %v463_v52 = vmax.f32 %v437_v47, 0.0 }
 0x235   :  { %v462_v50 = vmax.f32 %v432_v49, 0.0  ;;  %v991_v51 = vpop.f32.mrb[14].mxu1 }
 0x236   :  { %v447_v53 = vadd.f32 %v991_v51, %v766_v9  ;;  %v441_v54 = vpop.f32.mrb[15].mxu1 }
 0x237   :  { %v442_v55 = vadd.f32 %v766_v9, %v441_v54  ;;  %1042 = vmatprep.mubr.f32.mxu1 %v462_v50 }
 0x238   :  { %1043 = vmatmul.mubr.f32.gmra.mrb[20].mxu1 %v463_v52  ;;  %v465_v57 = vmax.f32 %v447_v53, 0.0 }
 0x239   :  { %v464_v56 = vmax.f32 %v442_v55, 0.0 }
 0x23b   :  { %1045 = vmatprep.mubr.f32.mxu1 %v464_v56 }
 0x23c   :  { %1046 = vmatmul.mubr.f32.gmra.mrb[22].mxu1 %v465_v57 }
 0x2f3   :  { %v1026_v59 = vpop.f32.mrb[16].mxu0 }
 0x2f4   :  { %v561_v60 = vadd.f32 %v1026_v59, %v1521_v58  ;;  %v555_v61 = vpop.f32.mrb[17].mxu0 }
 0x2f5   :  { %v556_v62 = vadd.f32 %v1521_v58, %v555_v61 }
 0x2f6   :  { %v769_v63 = vmul.f32 -1.442695, %v561_v60 }
 0x2f7   :  { %v768_v0 = vmul.f32 -1.442695, %v556_v62  ;;  %v1029_v1 = vpop.f32.mrb[18].mxu0 }
 0x2f8   :  { %1167 = vpow2.f32 %v769_v63  ;;  %v571_v2 = vadd.f32 %v1029_v1, %v1521_v58  ;;  %v565_v3 = vpop.f32.mrb[19].mxu0 }
 0x2f9   :  { %1169 = vpow2.f32 %v768_v0  ;;  %v566_v4 = vadd.f32 %v1521_v58, %v565_v3 }
 0x2fa   :  { %v771_v5 = vmul.f32 -1.442695, %v571_v2 }
 0x2fb   :  { %v770_v6 = vmul.f32 -1.442695, %v566_v4  ;;  %v1032_v7 = vpop.f32.mrb[20].mxu0 }
 0x2fc   :  { %1171 = vpow2.f32 %v771_v5  ;;  %v581_v8 = vadd.f32 %v1032_v7, %v1521_v58  ;;  %v575_v9 = vpop.f32.mrb[21].mxu0 }
 0x2fd   :  { %1173 = vpow2.f32 %v770_v6  ;;  %v576_v10 = vadd.f32 %v1521_v58, %v575_v9 }
 0x2fe   :  { %v773_v11 = vmul.f32 -1.442695, %v581_v8 }
 0x2ff   :  { %v772_v12 = vmul.f32 -1.442695, %v576_v10  ;;  %v1035_v13 = vpop.f32.mrb[22].mxu0 }
 0x300   :  { %1175 = vpow2.f32 %v773_v11  ;;  %v591_v14 = vadd.f32 %v1035_v13, %v1521_v58  ;;  %v585_v15 = vpop.f32.mrb[23].mxu0 }
 0x301   :  { %1177 = vpow2.f32 %v772_v12  ;;  %v586_v16 = vadd.f32 %v1521_v58, %v585_v15 }
 0x302   :  { %v1168_v17 = vpop.eup %1167  ;;  %v775_v18 = vmul.f32 -1.442695, %v591_v14 }
 0x303   :  { %v1170_v19 = vpop.eup %1169  ;;  %v683_v20 = vadd.f32 1.0, %v1168_v17  ;;  %v774_v21 = vmul.f32 -1.442695, %v586_v16  ;;  %v1038_v22 = vpop.f32.mrb[16].mxu1 }
 0x304   :  { %v682_v23 = vadd.f32 1.0, %v1170_v19  ;;  %1179 = vpow2.f32 %v775_v18  ;;  %v601_v24 = vadd.f32 %v1038_v22, %v1521_v58  ;;  %v595_v25 = vpop.f32.mrb[17].mxu1 }
 0x305   :  { %1181 = vrcp.f32 %v683_v20  ;;  %v596_v26 = vadd.f32 %v1521_v58, %v595_v25 }
 0x306   :  { %v1172_v27 = vpop.eup %1171  ;;  %1183 = vrcp.f32 %v682_v23  ;;  %v777_v28 = vmul.f32 -1.442695, %v601_v24 }
 0x307   :  { %v1174_v29 = vpop.eup %1173  ;;  %v685_v30 = vadd.f32 1.0, %v1172_v27  ;;  %1185 = vpow2.f32 %v774_v21  ;;  %v776_v31 = vmul.f32 -1.442695, %v596_v26  ;;  %v1041_v32 = vpop.f32.mrb[18].mxu1 }
 0x308   :  { %v684_v33 = vadd.f32 1.0, %v1174_v29  ;;  %1187 = vpow2.f32 %v777_v28  ;;  %v611_v34 = vadd.f32 %v1041_v32, %v1521_v58  ;;  %v605_v35 = vpop.f32.mrb[19].mxu1 }
 0x309   :  { %1189 = vrcp.f32 %v685_v30  ;;  %v606_v36 = vadd.f32 %v1521_v58, %v605_v35 }
 0x30a   :  { %v1176_v37 = vpop.eup %1175  ;;  %1191 = vrcp.f32 %v684_v33  ;;  %v779_v38 = vmul.f32 -1.442695, %v611_v34 }
 0x30b   :  { %v1178_v39 = vpop.eup %1177  ;;  %v687_v40 = vadd.f32 1.0, %v1176_v37  ;;  %1193 = vpow2.f32 %v776_v31  ;;  %v778_v41 = vmul.f32 -1.442695, %v606_v36  ;;  %v1044_v42 = vpop.f32.mrb[20].mxu1 }
 0x30c   :  { %v686_v43 = vadd.f32 1.0, %v1178_v39  ;;  %1195 = vpow2.f32 %v779_v38  ;;  %v621_v44 = vadd.f32 %v1044_v42, %v1521_v58  ;;  %v615_v45 = vpop.f32.mrb[21].mxu1 }
 0x30d   :  { %1197 = vrcp.f32 %v687_v40  ;;  %v616_v46 = vadd.f32 %v1521_v58, %v615_v45 }
 0x30e   :  { %v1180_v47 = vpop.eup %1179  ;;  %1199 = vrcp.f32 %v686_v43  ;;  %v781_v48 = vmul.f32 -1.442695, %v621_v44 }
 0x30f   :  { %v1182_v49 = vpop.eup %1181  ;;  %v689_v50 = vadd.f32 1.0, %v1180_v47  ;;  %1201 = vpow2.f32 %v778_v41  ;;  %v780_v51 = vmul.f32 -1.442695, %v616_v46  ;;  %v1047_v52 = vpop.f32.mrb[22].mxu1 }
 0x310   :  { %v1184_v53 = vpop.eup %1183  ;;  %731 = vst [vmem:[#allocation10 + $0x8] sm:$0xff] %v1182_v49  ;;  %1203 = vpow2.f32 %v781_v48  ;;  %v631_v54 = vadd.f32 %v1047_v52, %v1521_v58  ;;  %v625_v55 = vpop.f32.mrb[23].mxu1 }
 0x311   :  { %v1186_v56 = vpop.eup %1185  ;;  %730 = vst [vmem:[#allocation10] sm:$0xff] %v1184_v53  ;;  %1205 = vrcp.f32 %v689_v50  ;;  %v626_v57 = vadd.f32 %v1521_v58, %v625_v55 }
 0x312   :  { %v1188_v59 = vpop.eup %1187  ;;  %v688_v60 = vadd.f32 1.0, %v1186_v56  ;;  %1207 = vpow2.f32 %v780_v51  ;;  %v783_v61 = vmul.f32 -1.442695, %v631_v54 }
 0x313   :  { %v1190_v62 = vpop.eup %1189  ;;  %v691_v63 = vadd.f32 1.0, %v1188_v59  ;;  %v782_v0 = vmul.f32 -1.442695, %v626_v57 }
 0x314   :  { %v1192_v1 = vpop.eup %1191  ;;  %733 = vst [vmem:[#allocation10 + $0x18] sm:$0xff] %v1190_v62  ;;  %1209 = vrcp.f32 %v688_v60 }
 0x315   :  { %v1194_v2 = vpop.eup %1193  ;;  %732 = vst [vmem:[#allocation10 + $0x10] sm:$0xff] %v1192_v1  ;;  %1211 = vrcp.f32 %v691_v63 }
 0x316   :  { %v1196_v3 = vpop.eup %1195  ;;  %v690_v4 = vadd.f32 1.0, %v1194_v2  ;;  %1213 = vpow2.f32 %v783_v61 }
 0x317   :  { %v1198_v5 = vpop.eup %1197  ;;  %v693_v6 = vadd.f32 1.0, %v1196_v3  ;;  %1215 = vpow2.f32 %v782_v0 }
 0x318   :  { %v1200_v58 = vpop.eup %1199  ;;  %735 = vst [vmem:[#allocation10 + $0x28] sm:$0xff] %v1198_v5  ;;  %1217 = vrcp.f32 %v690_v4 }
 0x319   :  { %v1202_v7 = vpop.eup %1201  ;;  %734 = vst [vmem:[#allocation10 + $0x20] sm:$0xff] %v1200_v58  ;;  %1219 = vrcp.f32 %v693_v6 }
 0x31a   :  { %v1204_v8 = vpop.eup %1203  ;;  %v692_v9 = vadd.f32 1.0, %v1202_v7 }
 0x31b   :  { %v1206_v10 = vpop.eup %1205  ;;  %v695_v11 = vadd.f32 1.0, %v1204_v8 }
 0x31c   :  { %v1208_v12 = vpop.eup %1207  ;;  %737 = vst [vmem:[#allocation10 + $0x38] sm:$0xff] %v1206_v10  ;;  %1221 = vrcp.f32 %v692_v9 }
 0x31d   :  { %1223 = vrcp.f32 %v695_v11  ;;  %v694_v13 = vadd.f32 1.0, %v1208_v12 }
 0x31e   :  { %v1210_v14 = vpop.eup %1209 }
 0x31f   :  { %v1212_v15 = vpop.eup %1211  ;;  %736 = vst [vmem:[#allocation10 + $0x30] sm:$0xff] %v1210_v14  ;;  %1225 = vrcp.f32 %v694_v13 }
 0x320   :  { %v1214_v16 = vpop.eup %1213  ;;  %739 = vst [vmem:[#allocation10 + $0x48] sm:$0xff] %v1212_v15 }
 0x321   :  { %v1216_v17 = vpop.eup %1215  ;;  %v697_v18 = vadd.f32 1.0, %v1214_v16 }
 0x322   :  { %v1218_v19 = vpop.eup %1217  ;;  %v696_v20 = vadd.f32 1.0, %v1216_v17 }
 0x323   :  { %v1220_v21 = vpop.eup %1219  ;;  %738 = vst [vmem:[#allocation10 + $0x40] sm:$0xff] %v1218_v19  ;;  %1227 = vrcp.f32 %v697_v18 }
 0x324   :  { %741 = vst [vmem:[#allocation10 + $0x58] sm:$0xff] %v1220_v21  ;;  %1229 = vrcp.f32 %v696_v20 }
 0x326   :  { %v1222_v22 = vpop.eup %1221 }
 0x327   :  { %v1224_v23 = vpop.eup %1223  ;;  %740 = vst [vmem:[#allocation10 + $0x50] sm:$0xff] %v1222_v22 }
 0x328   :  { %743 = vst [vmem:[#allocation10 + $0x68] sm:$0xff] %v1224_v23 }
 0x329   :  { %v1226_v24 = vpop.eup %1225 }
 0x32a   :  { %742 = vst [vmem:[#allocation10 + $0x60] sm:$0xff] %v1226_v24 }
 0x32d   :  { %v1228_v25 = vpop.eup %1227 }
 0x32e   :  { %v1230_v26 = vpop.eup %1229  ;;  %745 = vst [vmem:[#allocation10 + $0x78] sm:$0xff] %v1228_v25 }
 0x32f   :  { %744 = vst [vmem:[#allocation10 + $0x70] sm:$0xff] %v1230_v26 }
 0x330   :  { %1330 = shalt.err (!%p1327_p8)
}
 0x331   :  { %s1331_s11 = scalar_lea.hbm %s1561_s7, 2048 }
 0x332   :  { %p1332_p9 = scmp.ne.s32.totalorder %s1561_s7, %s1331_s11  ;;  %p1335_p10 = scmp.lt.u32.totalorder %s1331_s11, %s1561_s7 }
 0x334   :  { %p1337_p11 = pnand %p1335_p10, %p1332_p9 }
 0x336   :  { %1340 = shalt.err (!%p1337_p11)
}
 0x337   :  { %757 = dma.vmem_to_hbm [thread:$0]  %s752_s30, 2048, %s1561_s7, [#allocation4], %s1351_s13, %s1351_s13, %s1352_s14  }
 0x338   :  { %1347 = dma.done.wait [#allocation4], 2048  }
 0x339   :  { %1348 = vsyncadd [#allocation4], 4294965248 }
 0x33a   :  { %761 = vsyncpa [#allocation3], 1 }
 0x33b   :  { %762 = vsyncpa [#allocation6], 1 }
 0x33c   :  { %763 = vsyncpa [#allocation9], 1 }
 0x33d   :  { %764 = vsyncpa [#allocation4], 1 }

</bundles_post_ra>
